<compile_context>
chip_gen: v5e
topology: v5e:2x2
jax: 0.10.0
libtpu: 0.0.40
codegen_flags: <defaults>
</compile_context>

<pallas_src>
import functools
import math

import jax
import jax.numpy as jnp
from jax.experimental import pallas as pl
from jax.experimental.pallas import tpu as pltpu


def _downsample_conv_kernel(ee0_ref, eo0_ref, oe_ref, oo_ref, ee1_ref, eo1_ref,
                            w_ref, b_ref, o_ref, *, th, wo):
    """Stride-2 3x3 conv (pad=1) for one (batch, row-tile) block.

    Tap slabs (bf16), each holding `th` output rows worth of input:
      ee0 : (1, th, wo+1, Cin)  even padded rows (dy=0), even padded cols
      eo0 : (1, th, wo,   Cin)  even padded rows (dy=0), odd  padded cols
      oe  : (1, th, wo+1, Cin)  odd  padded rows (dy=1), even padded cols
      oo  : (1, th, wo,   Cin)  odd  padded rows (dy=1), odd  padded cols
      ee1 : (1, th, wo+1, Cin)  even rows shifted by one (dy=2), even cols
      eo1 : (1, th, wo,   Cin)  even rows shifted by one (dy=2), odd  cols
    w_ref : (9, Cin, Cout) bf16, tap-major (row dy*3+dx holds w[:, :, dy, dx].T)
    b_ref : (1, Cout) f32
    o_ref : (1, th, wo, Cout) f32, channels lane-dense.
    """
    cout = o_ref.shape[-1]
    acc = jnp.zeros((th * wo, cout), jnp.float32)
    # tap k = dy*3 + dx  ->  (slab ref, static column offset; None = exact width)
    taps = (
        (ee0_ref, 0), (eo0_ref, None), (ee0_ref, 1),   # dy = 0
        (oe_ref, 0),  (oo_ref, None),  (oe_ref, 1),    # dy = 1
        (ee1_ref, 0), (eo1_ref, None), (ee1_ref, 1),   # dy = 2
    )
    for k, (p, ox) in enumerate(taps):
        xs = p[0] if ox is None else p[0, :, ox:ox + wo, :]     # (th, wo, Cin)
        xs = xs.reshape(th * wo, xs.shape[-1])
        acc = acc + jnp.dot(xs, w_ref[k], preferred_element_type=jnp.float32)
    o_ref[0] = (acc + b_ref[...]).reshape(th, wo, cout)         # fused bias add


def _row_tile(ho, wo, max_m=512):
    """Largest divisor th of ho with th * wo <= max_m (>= 1)."""
    target = max(1, max_m // max(wo, 1))
    th = 1
    for d in range(1, min(ho, target) + 1):
        if ho % d == 0:
            th = d
    return th


@jax.jit
def downsample_forward(x_nchw, w, b):
    """PyTorch Downsample.forward: Conv2d(dim, dim, 3, stride=2, padding=1).

    x_nchw : (B, C, H, W) f32 -> (B, C, H//2, W//2) f32.
    w      : (Cout, Cin, 3, 3) f32 (PyTorch layout), b : (Cout,) f32.
    """
    B, C, H, W = x_nchw.shape
    cout, cin, kh, kw = w.shape
    assert (kh, kw) == (3, 3) and cin == C
    assert H % 2 == 0 and W % 2 == 0  # TODO(synk): odd spatial sizes
    ho, wo = H // 2, W // 2
    wq = wo + 1
    th = _row_tile(ho, wo)
    nt = ho // th

    # NCHW -> NHWC, bf16 MXU operands (halves HBM/VMEM traffic), zero pad=1.
    x = jnp.transpose(x_nchw, (0, 2, 3, 1)).astype(jnp.bfloat16)
    xp = jnp.pad(x, ((0, 0), (1, 1), (1, 1), (0, 0)))       # (B, H+2, W+2, C)

    er = xp[:, 0::2, :, :]                                   # even padded rows
    orow = xp[:, 1::2, :, :]                                 # odd padded rows
    ee = er[:, :, 0::2, :]                                   # (B, ho+1, wo+1, C)
    eo = er[:, :, 1::2, :]
    oe = orow[:, :, 0::2, :]
    oo = orow[:, :, 1::2, :]
    ee0 = ee[:, 0:ho]                                        # dy=0, even cols
    eo0 = eo[:, 0:ho, 0:wo]                                  # dy=0, odd cols
    oe_ = oe[:, 0:ho]                                        # dy=1, even cols
    oo_ = oo[:, 0:ho, 0:wo]                                  # dy=1, odd cols
    ee1 = ee[:, 1:ho + 1]                                    # dy=2, even cols
    eo1 = eo[:, 1:ho + 1, 0:wo]                              # dy=2, odd cols

    # Weights: (Cout, Cin, 3, 3) -> (9, Cin, Cout), tap-major, bf16.
    w_taps = jnp.transpose(w, (2, 3, 1, 0)).reshape(9, cin, cout)
    w_taps = w_taps.astype(jnp.bfloat16)
    b_row = b.reshape(1, cout).astype(jnp.float32)

    wide_spec = pl.BlockSpec((1, th, wq, C), lambda bb, t: (bb, t, 0, 0))
    narrow_spec = pl.BlockSpec((1, th, wo, C), lambda bb, t: (bb, t, 0, 0))

    out = pl.pallas_call(
        functools.partial(_downsample_conv_kernel, th=th, wo=wo),
        grid=(B, nt),
        in_specs=[wide_spec, narrow_spec,        # ee0, eo0
                  wide_spec, narrow_spec,        # oe,  oo
                  wide_spec, narrow_spec,        # ee1, eo1
                  pl.BlockSpec((9, cin, cout), lambda bb, t: (0, 0, 0)),
                  pl.BlockSpec((1, cout), lambda bb, t: (0, 0))],
        out_specs=pl.BlockSpec((1, th, wo, cout), lambda bb, t: (bb, t, 0, 0)),
        out_shape=jax.ShapeDtypeStruct((B, ho, wo, cout), jnp.float32),
        compiler_params=pltpu.CompilerParams(
            dimension_semantics=("parallel", "parallel")),
    )(ee0, eo0, oe_, oo_, ee1, eo1, w_taps, b_row)

    return jnp.transpose(out, (0, 3, 1, 2))                  # NHWC -> NCHW


if __name__ == "__main__":
    key = jax.random.PRNGKey(0)
    kx, kw, kb = jax.random.split(key, 3)

    # Small but lane-dense test shapes: dim=128 channels, 16x16 spatial.
    dim, B, H, W = 128, 2, 16, 16
    x = jax.random.normal(kx, (B, dim, H, W), jnp.float32)

    bound = 1.0 / math.sqrt(dim * 3 * 3)                     # PyTorch conv init
    w = jax.random.uniform(kw, (dim, dim, 3, 3), jnp.float32, -bound, bound)
    b = jax.random.uniform(kb, (dim,), jnp.float32, -bound, bound)

    out = downsample_forward(x, w, b)
    out = jax.block_until_ready(out)
    assert out.shape == (B, dim, H // 2, W // 2), out.shape
    assert bool(jnp.all(jnp.isfinite(out)))

    # Numerical sanity check against the XLA conv (f32 reference).
    ref = jax.lax.conv_general_dilated(
        x, w, window_strides=(2, 2), padding=((1, 1), (1, 1)),
        dimension_numbers=("NCHW", "OIHW", "NCHW"),
        precision=jax.lax.Precision.HIGHEST)
    ref = ref + b[None, :, None, None]
    err = float(jnp.max(jnp.abs(out - ref)))
    assert jnp.allclose(out, ref, atol=5e-2, rtol=5e-2), err

    print("KERNEL_OK")
</pallas_src>

<mosaic_0001>
module attributes {stable_mosaic.version = 11 : i64} {
  func.func @_downsample_conv_kernel(%arg0: i32, %arg1: i32, %arg2: memref<1x8x9x128xbf16, #tpu.memory_space<vmem>>, %arg3: memref<1x8x8x128xbf16, #tpu.memory_space<vmem>>, %arg4: memref<1x8x9x128xbf16, #tpu.memory_space<vmem>>, %arg5: memref<1x8x8x128xbf16, #tpu.memory_space<vmem>>, %arg6: memref<1x8x9x128xbf16, #tpu.memory_space<vmem>>, %arg7: memref<1x8x8x128xbf16, #tpu.memory_space<vmem>>, %arg8: memref<9x128x128xbf16, #tpu.memory_space<vmem>>, %arg9: memref<1x128xf32, #tpu.memory_space<vmem>>, %arg10: memref<1x8x8x128xf32, #tpu.memory_space<vmem>>) attributes {dimension_semantics = [#tpu.dimension_semantics<parallel>, #tpu.dimension_semantics<parallel>], iteration_bounds = array<i64: 2, 1>, scalar_prefetch = 0 : i64, scratch_operands = 0 : i64, tpu.core_type = #tpu.core_type<tc>, window_params = [{transform_indices = @transform_0, window_bounds = array<i64: 1, 8, 9, 128>}, {transform_indices = @transform_1, window_bounds = array<i64: 1, 8, 8, 128>}, {transform_indices = @transform_2, window_bounds = array<i64: 1, 8, 9, 128>}, {transform_indices = @transform_3, window_bounds = array<i64: 1, 8, 8, 128>}, {transform_indices = @transform_4, window_bounds = array<i64: 1, 8, 9, 128>}, {transform_indices = @transform_5, window_bounds = array<i64: 1, 8, 8, 128>}, {pipeline_mode = #tpu.pipeline_mode<synchronous>, transform_indices = @transform_6, window_bounds = array<i64: 9, 128, 128>}, {pipeline_mode = #tpu.pipeline_mode<synchronous>, transform_indices = @transform_7, window_bounds = array<i64: 1, 128>}, {transform_indices = @transform_8, window_bounds = array<i64: 1, 8, 8, 128>}]} {
    %cst = arith.constant 0.000000e+00 : f32
    %0 = vector.broadcast %cst : f32 to vector<64x128xf32>
    %c0 = arith.constant 0 : index
    %c0_0 = arith.constant 0 : index
    %c0_1 = arith.constant 0 : index
    %c0_2 = arith.constant 0 : index
    %1 = vector.load %arg2[%c0, %c0_0, %c0_1, %c0_2] : memref<1x8x9x128xbf16, #tpu.memory_space<vmem>>, vector<1x8x8x128xbf16>
    %2 = vector.shape_cast %1 : vector<1x8x8x128xbf16> to vector<8x8x128xbf16>
    %3 = vector.shape_cast %2 : vector<8x8x128xbf16> to vector<64x128xbf16>
    %c0_3 = arith.constant 0 : index
    %c0_4 = arith.constant 0 : index
    %c0_5 = arith.constant 0 : index
    %4 = vector.load %arg8[%c0_3, %c0_4, %c0_5] : memref<9x128x128xbf16, #tpu.memory_space<vmem>>, vector<1x128x128xbf16>
    %5 = vector.shape_cast %4 : vector<1x128x128xbf16> to vector<128x128xbf16>
    %cst_6 = arith.constant dense<0.000000e+00> : vector<64x128xf32>
    %6 = tpu.matmul %3, %5, %cst_6 {dimension_numbers = #tpu.dot_dimension_numbers<[1], [0], [0], [1], [0, 0, 1, 1], [], []>} : vector<64x128xbf16>, vector<128x128xbf16>, vector<64x128xf32> -> vector<64x128xf32>
    %7 = arith.addf %0, %6 : vector<64x128xf32>
    %c0_7 = arith.constant 0 : index
    %c0_8 = arith.constant 0 : index
    %c0_9 = arith.constant 0 : index
    %c0_10 = arith.constant 0 : index
    %8 = vector.load %arg3[%c0_7, %c0_8, %c0_9, %c0_10] : memref<1x8x8x128xbf16, #tpu.memory_space<vmem>>, vector<1x8x8x128xbf16>
    %9 = vector.shape_cast %8 : vector<1x8x8x128xbf16> to vector<8x8x128xbf16>
    %10 = vector.shape_cast %9 : vector<8x8x128xbf16> to vector<64x128xbf16>
    %c1 = arith.constant 1 : index
    %c0_11 = arith.constant 0 : index
    %c0_12 = arith.constant 0 : index
    %11 = vector.load %arg8[%c1, %c0_11, %c0_12] : memref<9x128x128xbf16, #tpu.memory_space<vmem>>, vector<1x128x128xbf16>
    %12 = vector.shape_cast %11 : vector<1x128x128xbf16> to vector<128x128xbf16>
    %cst_13 = arith.constant dense<0.000000e+00> : vector<64x128xf32>
    %13 = tpu.matmul %10, %12, %cst_13 {dimension_numbers = #tpu.dot_dimension_numbers<[1], [0], [0], [1], [0, 0, 1, 1], [], []>} : vector<64x128xbf16>, vector<128x128xbf16>, vector<64x128xf32> -> vector<64x128xf32>
    %14 = arith.addf %7, %13 : vector<64x128xf32>
    %c0_14 = arith.constant 0 : index
    %c0_15 = arith.constant 0 : index
    %c1_16 = arith.constant 1 : index
    %c0_17 = arith.constant 0 : index
    %15 = vector.load %arg2[%c0_14, %c0_15, %c1_16, %c0_17] : memref<1x8x9x128xbf16, #tpu.memory_space<vmem>>, vector<1x8x8x128xbf16>
    %16 = vector.shape_cast %15 : vector<1x8x8x128xbf16> to vector<8x8x128xbf16>
    %17 = vector.shape_cast %16 : vector<8x8x128xbf16> to vector<64x128xbf16>
    %c2 = arith.constant 2 : index
    %c0_18 = arith.constant 0 : index
    %c0_19 = arith.constant 0 : index
    %18 = vector.load %arg8[%c2, %c0_18, %c0_19] : memref<9x128x128xbf16, #tpu.memory_space<vmem>>, vector<1x128x128xbf16>
    %19 = vector.shape_cast %18 : vector<1x128x128xbf16> to vector<128x128xbf16>
    %cst_20 = arith.constant dense<0.000000e+00> : vector<64x128xf32>
    %20 = tpu.matmul %17, %19, %cst_20 {dimension_numbers = #tpu.dot_dimension_numbers<[1], [0], [0], [1], [0, 0, 1, 1], [], []>} : vector<64x128xbf16>, vector<128x128xbf16>, vector<64x128xf32> -> vector<64x128xf32>
    %21 = arith.addf %14, %20 : vector<64x128xf32>
    %c0_21 = arith.constant 0 : index
    %c0_22 = arith.constant 0 : index
    %c0_23 = arith.constant 0 : index
    %c0_24 = arith.constant 0 : index
    %22 = vector.load %arg4[%c0_21, %c0_22, %c0_23, %c0_24] : memref<1x8x9x128xbf16, #tpu.memory_space<vmem>>, vector<1x8x8x128xbf16>
    %23 = vector.shape_cast %22 : vector<1x8x8x128xbf16> to vector<8x8x128xbf16>
    %24 = vector.shape_cast %23 : vector<8x8x128xbf16> to vector<64x128xbf16>
    %c3 = arith.constant 3 : index
    %c0_25 = arith.constant 0 : index
    %c0_26 = arith.constant 0 : index
    %25 = vector.load %arg8[%c3, %c0_25, %c0_26] : memref<9x128x128xbf16, #tpu.memory_space<vmem>>, vector<1x128x128xbf16>
    %26 = vector.shape_cast %25 : vector<1x128x128xbf16> to vector<128x128xbf16>
    %cst_27 = arith.constant dense<0.000000e+00> : vector<64x128xf32>
    %27 = tpu.matmul %24, %26, %cst_27 {dimension_numbers = #tpu.dot_dimension_numbers<[1], [0], [0], [1], [0, 0, 1, 1], [], []>} : vector<64x128xbf16>, vector<128x128xbf16>, vector<64x128xf32> -> vector<64x128xf32>
    %28 = arith.addf %21, %27 : vector<64x128xf32>
    %c0_28 = arith.constant 0 : index
    %c0_29 = arith.constant 0 : index
    %c0_30 = arith.constant 0 : index
    %c0_31 = arith.constant 0 : index
    %29 = vector.load %arg5[%c0_28, %c0_29, %c0_30, %c0_31] : memref<1x8x8x128xbf16, #tpu.memory_space<vmem>>, vector<1x8x8x128xbf16>
    %30 = vector.shape_cast %29 : vector<1x8x8x128xbf16> to vector<8x8x128xbf16>
    %31 = vector.shape_cast %30 : vector<8x8x128xbf16> to vector<64x128xbf16>
    %c4 = arith.constant 4 : index
    %c0_32 = arith.constant 0 : index
    %c0_33 = arith.constant 0 : index
    %32 = vector.load %arg8[%c4, %c0_32, %c0_33] : memref<9x128x128xbf16, #tpu.memory_space<vmem>>, vector<1x128x128xbf16>
    %33 = vector.shape_cast %32 : vector<1x128x128xbf16> to vector<128x128xbf16>
    %cst_34 = arith.constant dense<0.000000e+00> : vector<64x128xf32>
    %34 = tpu.matmul %31, %33, %cst_34 {dimension_numbers = #tpu.dot_dimension_numbers<[1], [0], [0], [1], [0, 0, 1, 1], [], []>} : vector<64x128xbf16>, vector<128x128xbf16>, vector<64x128xf32> -> vector<64x128xf32>
    %35 = arith.addf %28, %34 : vector<64x128xf32>
    %c0_35 = arith.constant 0 : index
    %c0_36 = arith.constant 0 : index
    %c1_37 = arith.constant 1 : index
    %c0_38 = arith.constant 0 : index
    %36 = vector.load %arg4[%c0_35, %c0_36, %c1_37, %c0_38] : memref<1x8x9x128xbf16, #tpu.memory_space<vmem>>, vector<1x8x8x128xbf16>
    %37 = vector.shape_cast %36 : vector<1x8x8x128xbf16> to vector<8x8x128xbf16>
    %38 = vector.shape_cast %37 : vector<8x8x128xbf16> to vector<64x128xbf16>
    %c5 = arith.constant 5 : index
    %c0_39 = arith.constant 0 : index
    %c0_40 = arith.constant 0 : index
    %39 = vector.load %arg8[%c5, %c0_39, %c0_40] : memref<9x128x128xbf16, #tpu.memory_space<vmem>>, vector<1x128x128xbf16>
    %40 = vector.shape_cast %39 : vector<1x128x128xbf16> to vector<128x128xbf16>
    %cst_41 = arith.constant dense<0.000000e+00> : vector<64x128xf32>
    %41 = tpu.matmul %38, %40, %cst_41 {dimension_numbers = #tpu.dot_dimension_numbers<[1], [0], [0], [1], [0, 0, 1, 1], [], []>} : vector<64x128xbf16>, vector<128x128xbf16>, vector<64x128xf32> -> vector<64x128xf32>
    %42 = arith.addf %35, %41 : vector<64x128xf32>
    %c0_42 = arith.constant 0 : index
    %c0_43 = arith.constant 0 : index
    %c0_44 = arith.constant 0 : index
    %c0_45 = arith.constant 0 : index
    %43 = vector.load %arg6[%c0_42, %c0_43, %c0_44, %c0_45] : memref<1x8x9x128xbf16, #tpu.memory_space<vmem>>, vector<1x8x8x128xbf16>
    %44 = vector.shape_cast %43 : vector<1x8x8x128xbf16> to vector<8x8x128xbf16>
    %45 = vector.shape_cast %44 : vector<8x8x128xbf16> to vector<64x128xbf16>
    %c6 = arith.constant 6 : index
    %c0_46 = arith.constant 0 : index
    %c0_47 = arith.constant 0 : index
    %46 = vector.load %arg8[%c6, %c0_46, %c0_47] : memref<9x128x128xbf16, #tpu.memory_space<vmem>>, vector<1x128x128xbf16>
    %47 = vector.shape_cast %46 : vector<1x128x128xbf16> to vector<128x128xbf16>
    %cst_48 = arith.constant dense<0.000000e+00> : vector<64x128xf32>
    %48 = tpu.matmul %45, %47, %cst_48 {dimension_numbers = #tpu.dot_dimension_numbers<[1], [0], [0], [1], [0, 0, 1, 1], [], []>} : vector<64x128xbf16>, vector<128x128xbf16>, vector<64x128xf32> -> vector<64x128xf32>
    %49 = arith.addf %42, %48 : vector<64x128xf32>
    %c0_49 = arith.constant 0 : index
    %c0_50 = arith.constant 0 : index
    %c0_51 = arith.constant 0 : index
    %c0_52 = arith.constant 0 : index
    %50 = vector.load %arg7[%c0_49, %c0_50, %c0_51, %c0_52] : memref<1x8x8x128xbf16, #tpu.memory_space<vmem>>, vector<1x8x8x128xbf16>
    %51 = vector.shape_cast %50 : vector<1x8x8x128xbf16> to vector<8x8x128xbf16>
    %52 = vector.shape_cast %51 : vector<8x8x128xbf16> to vector<64x128xbf16>
    %c7 = arith.constant 7 : index
    %c0_53 = arith.constant 0 : index
    %c0_54 = arith.constant 0 : index
    %53 = vector.load %arg8[%c7, %c0_53, %c0_54] : memref<9x128x128xbf16, #tpu.memory_space<vmem>>, vector<1x128x128xbf16>
    %54 = vector.shape_cast %53 : vector<1x128x128xbf16> to vector<128x128xbf16>
    %cst_55 = arith.constant dense<0.000000e+00> : vector<64x128xf32>
    %55 = tpu.matmul %52, %54, %cst_55 {dimension_numbers = #tpu.dot_dimension_numbers<[1], [0], [0], [1], [0, 0, 1, 1], [], []>} : vector<64x128xbf16>, vector<128x128xbf16>, vector<64x128xf32> -> vector<64x128xf32>
    %56 = arith.addf %49, %55 : vector<64x128xf32>
    %c0_56 = arith.constant 0 : index
    %c0_57 = arith.constant 0 : index
    %c1_58 = arith.constant 1 : index
    %c0_59 = arith.constant 0 : index
    %57 = vector.load %arg6[%c0_56, %c0_57, %c1_58, %c0_59] : memref<1x8x9x128xbf16, #tpu.memory_space<vmem>>, vector<1x8x8x128xbf16>
    %58 = vector.shape_cast %57 : vector<1x8x8x128xbf16> to vector<8x8x128xbf16>
    %59 = vector.shape_cast %58 : vector<8x8x128xbf16> to vector<64x128xbf16>
    %c8 = arith.constant 8 : index
    %c0_60 = arith.constant 0 : index
    %c0_61 = arith.constant 0 : index
    %60 = vector.load %arg8[%c8, %c0_60, %c0_61] : memref<9x128x128xbf16, #tpu.memory_space<vmem>>, vector<1x128x128xbf16>
    %61 = vector.shape_cast %60 : vector<1x128x128xbf16> to vector<128x128xbf16>
    %cst_62 = arith.constant dense<0.000000e+00> : vector<64x128xf32>
    %62 = tpu.matmul %59, %61, %cst_62 {dimension_numbers = #tpu.dot_dimension_numbers<[1], [0], [0], [1], [0, 0, 1, 1], [], []>} : vector<64x128xbf16>, vector<128x128xbf16>, vector<64x128xf32> -> vector<64x128xf32>
    %63 = arith.addf %56, %62 : vector<64x128xf32>
    %c0_63 = arith.constant 0 : index
    %c0_64 = arith.constant 0 : index
    %64 = vector.load %arg9[%c0_63, %c0_64] : memref<1x128xf32, #tpu.memory_space<vmem>>, vector<1x128xf32>
    %65 = vector.broadcast %64 : vector<1x128xf32> to vector<64x128xf32>
    %66 = arith.addf %63, %65 : vector<64x128xf32>
    %67 = vector.shape_cast %66 : vector<64x128xf32> to vector<8x8x128xf32>
    %c0_65 = arith.constant 0 : index
    %c0_66 = arith.constant 0 : index
    %c0_67 = arith.constant 0 : index
    %c0_68 = arith.constant 0 : index
    %68 = vector.load %arg10[%c0_65, %c0_66, %c0_67, %c0_68] : memref<1x8x8x128xf32, #tpu.memory_space<vmem>>, vector<1x8x8x128xf32>
    %69 = vector.shape_cast %68 : vector<1x8x8x128xf32> to vector<8x8x128xf32>
    %70 = vector.shape_cast %67 : vector<8x8x128xf32> to vector<1x8x8x128xf32>
    tpu.vector_store %arg10[%c0_65, %c0_66, %c0_67, %c0_68], %70 {strides = array<i32>} : memref<1x8x8x128xf32, #tpu.memory_space<vmem>>, vector<1x8x8x128xf32>,
    return
  }
  func.func @transform_0(%arg0: i32, %arg1: i32) -> (i32, i32, i32, i32) {
    %c0_i32 = arith.constant 0 : i32
    %c0_i32_0 = arith.constant 0 : i32
    %c0_i32_1 = arith.constant 0 : i32
    return %arg0, %arg1, %c0_i32, %c0_i32_0 : i32, i32, i32, i32
  }
  func.func @transform_1(%arg0: i32, %arg1: i32) -> (i32, i32, i32, i32) {
    %c0_i32 = arith.constant 0 : i32
    %c0_i32_0 = arith.constant 0 : i32
    %c0_i32_1 = arith.constant 0 : i32
    return %arg0, %arg1, %c0_i32, %c0_i32_0 : i32, i32, i32, i32
  }
  func.func @transform_2(%arg0: i32, %arg1: i32) -> (i32, i32, i32, i32) {
    %c0_i32 = arith.constant 0 : i32
    %c0_i32_0 = arith.constant 0 : i32
    %c0_i32_1 = arith.constant 0 : i32
    return %arg0, %arg1, %c0_i32, %c0_i32_0 : i32, i32, i32, i32
  }
  func.func @transform_3(%arg0: i32, %arg1: i32) -> (i32, i32, i32, i32) {
    %c0_i32 = arith.constant 0 : i32
    %c0_i32_0 = arith.constant 0 : i32
    %c0_i32_1 = arith.constant 0 : i32
    return %arg0, %arg1, %c0_i32, %c0_i32_0 : i32, i32, i32, i32
  }
  func.func @transform_4(%arg0: i32, %arg1: i32) -> (i32, i32, i32, i32) {
    %c0_i32 = arith.constant 0 : i32
    %c0_i32_0 = arith.constant 0 : i32
    %c0_i32_1 = arith.constant 0 : i32
    return %arg0, %arg1, %c0_i32, %c0_i32_0 : i32, i32, i32, i32
  }
  func.func @transform_5(%arg0: i32, %arg1: i32) -> (i32, i32, i32, i32) {
    %c0_i32 = arith.constant 0 : i32
    %c0_i32_0 = arith.constant 0 : i32
    %c0_i32_1 = arith.constant 0 : i32
    return %arg0, %arg1, %c0_i32, %c0_i32_0 : i32, i32, i32, i32
  }
  func.func @transform_6(%arg0: i32, %arg1: i32) -> (i32, i32, i32) {
    %c0_i32 = arith.constant 0 : i32
    %c0_i32_0 = arith.constant 0 : i32
    %c0_i32_1 = arith.constant 0 : i32
    %c0_i32_2 = arith.constant 0 : i32
    return %c0_i32, %c0_i32_0, %c0_i32_1 : i32, i32, i32
  }
  func.func @transform_7(%arg0: i32, %arg1: i32) -> (i32, i32) {
    %c0_i32 = arith.constant 0 : i32
    %c0_i32_0 = arith.constant 0 : i32
    %c0_i32_1 = arith.constant 0 : i32
    return %c0_i32, %c0_i32_0 : i32, i32
  }
  func.func @transform_8(%arg0: i32, %arg1: i32) -> (i32, i32, i32, i32) {
    %c0_i32 = arith.constant 0 : i32
    %c0_i32_0 = arith.constant 0 : i32
    %c0_i32_1 = arith.constant 0 : i32
    return %arg0, %arg1, %c0_i32, %c0_i32_0 : i32, i32, i32, i32
  }
}

</mosaic_0001>

<bundles_post_ra>
// kernel: downsample_forward.1
= control target key start
LH: loop header
LB: loop body
LE: loop exit
PB: predicated region body
PF: predicated region fallthrough
CT: control target
= control target key end

     0   :  { %s3667_s0 = inlined_call_operand.vmem [shape: bf16[2,8,9,128], index: 0, kind: input, shape index: {}]   ;;  %s3668_s1 = inlined_call_operand.vmem [shape: bf16[2,8,8,128], index: 1, kind: input, shape index: {}]   ;;  %s3669_s2 = inlined_call_operand.vmem [shape: bf16[2,8,9,128], index: 2, kind: input, shape index: {}]   ;;  %s3670_s3 = inlined_call_operand.vmem [shape: bf16[2,8,8,128], index: 3, kind: input, shape index: {}]   ;;  %s3671_s4 = inlined_call_operand.vmem [shape: bf16[2,8,9,128], index: 4, kind: input, shape index: {}]   ;;  %s3672_s5 = inlined_call_operand.vmem [shape: bf16[2,8,8,128], index: 5, kind: input, shape index: {}]   ;;  %s3673_s6 = inlined_call_operand.vmem [shape: bf16[9,128,128], index: 6, kind: input, shape index: {}]   ;;  %s3674_s7 = inlined_call_operand.vmem [shape: f32[1,128], index: 7, kind: input, shape index: {}]   ;;  %s3675_s8 = inlined_call_operand.hbm [shape: f32[2,8,8,128], index: 8, kind: output, shape index: {}]  }
   0x1   :  { %3677 = sst [smem:[#allocation6_spill]] %s3667_s0 }
   0x2   :  { %3678 = sst [smem:[#allocation7_spill]] %s3668_s1 }
   0x3   :  { %13 = vsyncpa [#allocation3], 0 }
   0x4   :  { %15 = vsyncpa [#allocation3 + $0x1], 0  ;;  %s3107_s27 = smov 0   ;;  %s3109_s28 = smov 0  }
   0x5   :  { %s3111_s29 = smov 0   ;;  %s3113_s30 = smov 0  }
   0x6   :  { %s3115_s9 = smov 0   ;;  %s3117_s10 = smov 0  }
   0x7 LB: > { %s2268_s11 = sadd.s32 4294967295, %s3058_s10   ;;  %s2269_s12 = sadd.s32 4294967294, %s3058_s10   ;;  %s3058_s10 = sphi %s3117_s10, %s21_s10   ;;  %s3054_s9 = sphi %s3115_s9, %s3691_s9   ;;  %s3050_s30 = sphi %s3113_s30, %s3690_s30   ;;  %s3046_s29 = sphi %s3111_s29, %s3689_s29   ;;  %s3042_s28 = sphi %s3109_s28, %s3688_s28   ;;  %s3038_s27 = sphi %s3107_s27, %s3687_s27  }
   0x8   : > { %s33_s13 = sadd.s32 1, %s3054_s9  ;;  %s252_s14 = sadd.s32 1, %s3046_s29 }
   0x9   : > { %p35_p0 = scmp.ge.s32.totalorder %s33_s13, 2  ;;  %p262_p1 = scmp.ne.s32.totalorder %s3046_s29, %s3042_s28 }
   0xa   : > { %p263_p2 = scmp.eq.s32.totalorder %s2268_s11, 1  ;;  %p268_p3 = scmp.ne.s32.totalorder %s3042_s28, %s3038_s27 }
   0xb   : > { %s3693_s13 = smov (%p35_p0, %s33_s13), 0  ;;  %p269_p5 = scmp.eq.s32.totalorder %s2269_s12, 1 }
   0xc   : > { %3679 = sst [smem:[#allocation5_spill]] %s3693_s13  ;;  %p3147_p4 = por %p263_p2, %p262_p1 }
   0xd   : > { %s247_s16 = ssub.s32 %s3054_s9, %s3693_s13  ;;  %p2272_p6 = scmp.ge.s32.totalorder %s3058_s10, 1 }
   0xe   : > { %p250_p7 = scmp.eq.s32.totalorder %s247_s16, 0  ;;  %p3154_p8 = por %p269_p5, %p268_p3 }
   0xf   : > { %p374_p9 = scmp.lt.s32.totalorder %s3058_s10, 3 }
  0x10   : > { %s3160_s18 = scalar_select %p250_p7, %s3046_s29, %s252_s14  }
  0x11   : > { %p375_p10 = pnand %p2272_p6, %p374_p9 }
  0x12   : > { %p461_p11 = scmp.lt.s32.totalorder (!%p375_p10), %s3050_s30, 1  ;;  %s3682_s0 = sld [smem:[#allocation6_spill]] (!%p375_p10) }
  0x13   : > { %378 = sbr.rel (%p375_p10) target bundleno = 348 (0x15c), region = 52  ;;  %s3685_s1 = sld [smem:[#allocation7_spill]] (!%p375_p10) }
  0x14   : > { %s2905_s19 = sshll.u32 (!%p375_p10), %s3050_s30, 6 }
  0x15   : > { %s2086_s23 = scalar_lea.hbm (!%p375_p10), %s3675_s8, %s2905_s19 }
  0x18   : > { %v2832_v0 = vld [vmem:[%s3673_s6 + $0x78] sm:$0xff]  ;;  %v2831_v2 = vld [vmem:[%s3673_s6 + $0x70] sm:$0xff]  ;;  %s3173_s25 = scalar_select %p461_p11, %s3050_s30, 1  ;;  %v2830_v6 = vld [vmem:[%s3673_s6 + $0x68] sm:$0xff]  ;;  %vm791_vm0 = vsmask.f32 3328 }
  0x19   : > { %v2840_v1 = vld [vmem:[%s3673_s6 + $0xb8] sm:$0xff]  ;;  %2906 = vmatpush.bf16.msra.mxu1 %v2832_v0  ;;  %645 = vmatpush.bf16.msra.mxu0 %v2832_v0  ;;  %v2839_v3 = vld [vmem:[%s3673_s6 + $0xb0] sm:$0xff]  ;;  %v2838_v7 = vld [vmem:[%s3673_s6 + $0xa8] sm:$0xff]  ;;  %vm792_vm1 = vsmask.f32 7440 }
  0x1a   : > { %987 = vmatpush.bf16.msra.mxu2 %v2840_v1  ;;  %v2852_v4 = vld [vmem:[%s3673_s6 + $0xf8] sm:$0xff]  ;;  %s3182_s16 = sshll.u32 %s3173_s25, 6  ;;  %v2851_v5 = vld [vmem:[%s3673_s6 + $0xf0] sm:$0xff]  ;;  %v2850_v8 = vld [vmem:[%s3673_s6 + $0xe8] sm:$0xff]  ;;  %s3243_s22 = sshll.u32 %s3173_s25, 5 }
  0x1b   : > { %1121 = vmatpush.bf16.msra.mxu3 %v2852_v4  ;;  %s3194_s26 = scalar_lea.vmem %s3682_s0, %s3182_s16  ;;  %v2829_v11 = vld [vmem:[%s3673_s6 + $0x60] sm:$0xff]  ;;  %v2828_v24 = vld [vmem:[%s3673_s6 + $0x58] sm:$0xff]  ;;  %v2827_v31 = vld [vmem:[%s3673_s6 + $0x50] sm:$0xff]  ;;  %s3263_s21 = scalar_lea.vmem %s3685_s1, %s3243_s22 }
  0x1c   : > { %v775_v9 = vld [vmem:[%s3194_s26] sm:$0xf]  ;;  %v777_v10 = vld [vmem:[%s3194_s26 + $0x8] sm:$0xf]  ;;  %v776_v16 = vld [vmem:[%s3194_s26 + $0x4] sm:$0x1]  ;;  %s3270_s11 = scalar_lea.vmem %s3669_s2, %s3182_s16  ;;  %s3464_s0 = scalar_lea.vmem %s3671_s4, %s3182_s16 }
  0x1d   : > { %2907 = vmatpush.bf16.msra.mxu1 %v2831_v2  ;;  %646 = vmatpush.bf16.msra.mxu0 %v2831_v2  ;;  %v795_v12 = vshrl.u32 %v775_v9, 16  ;;  %v798_v13 = vshll.u32 %v775_v9, 16  ;;  %v809_v14 = vshrl.u32 %v777_v10, 16  ;;  %v2837_v15 = vld [vmem:[%s3673_s6 + $0xa0] sm:$0xff]  ;;  %v812_v17 = vshll.u32 %v777_v10, 16  ;;  %v2836_v25 = vld [vmem:[%s3673_s6 + $0x98] sm:$0xff]  ;;  %vm3232_vm2 = vmor %vm791_vm0, %vm792_vm1  ;;  %s3478_s13 = scalar_lea.vmem %s3672_s5, %s3243_s22 }
  0x1e   : > { %988 = vmatpush.bf16.msra.mxu2 %v2839_v3  ;;  %v778_v18 = vld [vmem:[%s3194_s26 + $0xc] sm:$0x1]  ;;  %v2849_v22 = vld [vmem:[%s3673_s6 + $0xe0] sm:$0xff]  ;;  %v804_v27 = vshll.u32 %v776_v16, 16  ;;  %v2848_v30 = vld [vmem:[%s3673_s6 + $0xd8] sm:$0xff]  ;;  %s2089_s16 = sshll.u32 %s2086_s23, 4  ;;  %s2090_s16 = int_to_ptr.hbm [resolvable:$true] %s2089_s16 }
  0x1f   : > { %1122 = vmatpush.bf16.msra.mxu3 %v2851_v5  ;;  %v797_v19 = vrot.slane %v795_v12, 4  ;;  %v800_v20 = vrot.slane %v798_v13, 5  ;;  %v811_v21 = vrot.slane %v809_v14, 4  ;;  %v814_v23 = vrot.slane %v812_v17, 5  ;;  %v779_v32 = vld [vmem:[%s3194_s26 + $0x10] sm:$0xf] }
  0x20   : > { %v818_v29 = vshll.u32 %v778_v18, 16  ;;  %v781_v33 = vld [vmem:[%s3194_s26 + $0x18] sm:$0xf]  ;;  %v2835_v34 = vld [vmem:[%s3673_s6 + $0x90] sm:$0xff]  ;;  %v806_v36 = vrot.slane %v804_v27, 5  ;;  %v823_v41 = vshrl.u32 %v779_v32, 16 }
  0x21   : > { %2908 = vmatpush.bf16.msra.mxu1 %v2830_v6  ;;  %647 = vmatpush.bf16.msra.mxu0 %v2830_v6  ;;  %v801_v26 = vor.u32 %v800_v20, %v797_v19  ;;  %v815_v28 = vor.u32 %v814_v23, %v811_v21  ;;  %v2847_v40 = vld [vmem:[%s3673_s6 + $0xd0] sm:$0xff]  ;;  %v826_v42 = vshll.u32 %v779_v32, 16  ;;  %v837_v43 = vshrl.u32 %v781_v33, 16  ;;  %v2826_v45 = vld [vmem:[%s3673_s6 + $0x48] sm:$0xff]  ;;  %v2825_v55 = vld [vmem:[%s3673_s6 + $0x40] sm:$0xff]  ;;  %s2994_s1 = sshra.s32 %s2090_s16, 4  ;;  %s2995_s1 = int_to_ptr.hbm [resolvable:$true] %s2994_s1 }
  0x22   : > { %989 = vmatpush.bf16.msra.mxu2 %v2838_v7  ;;  %v820_v38 = vrot.slane %v818_v29, 5  ;;  %v840_v44 = vshll.u32 %v781_v33, 16  ;;  %v2834_v46 = vld [vmem:[%s3673_s6 + $0x88] sm:$0xff]  ;;  %v780_v50 = vld [vmem:[%s3194_s26 + $0x14] sm:$0x1]  ;;  %v825_v51 = vrot.slane %v823_v41, 4  ;;  %p3001_p1 = scmp.lt.s32.totalorder %s2995_s1, %s3675_s8 }
  0x23   : > { %1123 = vmatpush.bf16.msra.mxu3 %v2850_v8  ;;  %v802_v35 = vrot.slane %v801_v26, 4  ;;  %v816_v37 = vrot.slane %v815_v28, 4  ;;  %v2846_v49 = vld [vmem:[%s3673_s6 + $0xc8] sm:$0xff]  ;;  %v828_v52 = vrot.slane %v826_v42, 5  ;;  %v839_v53 = vrot.slane %v837_v43, 4  ;;  %v2820_v59 = vld [vmem:[%s3673_s6 + $0x38] sm:$0xff] }
  0x24   : > { %v842_v54 = vrot.slane %v840_v44, 5  ;;  %v782_v58 = vld [vmem:[%s3194_s26 + $0x1c] sm:$0x1]  ;;  %v2833_v60 = vld [vmem:[%s3673_s6 + $0x80] sm:$0xff]  ;;  %v832_v63 = vshll.u32 %v780_v50, 16  ;;  %v2823_v0 = vld [vmem:[%s3263_s21 + $0x10] sm:$0xff] }
  0x25   : > { %2909 = vmatpush.bf16.msra.mxu1 %v2829_v11  ;;  %648 = vmatpush.bf16.msra.mxu0 %v2829_v11  ;;  %v807_v47 = vsel %vm3232_vm2, %v802_v35, %v806_v36  ;;  %v821_v48 = vsel %vm3232_vm2, %v816_v37, %v820_v38  ;;  %v2864_v61 = vld [vmem:[%s3673_s6 + $0x138] sm:$0xff]  ;;  %v2821_v1 = vld [vmem:[%s3263_s21] sm:$0xff]  ;;  %v829_v2 = vor.u32 %v828_v52, %v825_v51  ;;  %v846_v4 = vshll.u32 %v782_v58, 16  ;;  %v2841_v8 = vld [vmem:[%s3270_s11 + $0x4] sm:$0xf0] }
  0x26   : > { %990 = vmatpush.bf16.msra.mxu2 %v2837_v15  ;;  %v923_v56 = vunpack.c.l.b16 %v807_v47  ;;  %v924_v57 = vunpack.c.l.b16 %v821_v48  ;;  %v2884_v62 = vld [vmem:[%s3673_s6 + $0x1b8] sm:$0xff]  ;;  %v843_v3 = vor.u32 %v842_v54, %v839_v53  ;;  %v2845_v6 = vld [vmem:[%s3673_s6 + $0xc0] sm:$0xff]  ;;  %v2819_v9 = vld [vmem:[%s3673_s6 + $0x30] sm:$0xff]  ;;  %v834_v12 = vrot.slane %v832_v63, 5 }
  0x27   : > { %1124 = vmatpush.bf16.msra.mxu3 %v2849_v22  ;;  %v2464_v7 = vld [vmem:[%s3270_s11] sm:$0xf]  ;;  %v2896_v10 = vld [vmem:[%s3673_s6 + $0x1f8] sm:$0xff]  ;;  %v2863_v11 = vld [vmem:[%s3673_s6 + $0x130] sm:$0xff]  ;;  %v830_v15 = vrot.slane %v829_v2, 4  ;;  %v848_v17 = vrot.slane %v846_v4, 5 }
  0x28   : > { %v931_v5 = vpack.c.b16 %v924_v57, %v923_v56  ;;  %v2883_v13 = vld [vmem:[%s3673_s6 + $0x1b0] sm:$0xff]  ;;  %v2465_v14 = vor.u32 %v2841_v8, %v2464_v7  ;;  %v844_v16 = vrot.slane %v843_v3, 4  ;;  %v2818_v18 = vld [vmem:[%s3673_s6 + $0x28] sm:$0xff]  ;;  %v783_v20 = vld [vmem:[%s3194_s26 + $0x20] sm:$0xf] }
  0x29   : > { %2910 = vmatpush.bf16.msra.mxu1 %v2828_v24  ;;  %649 = vmatpush.bf16.msra.mxu0 %v2828_v24  ;;  %v2895_v19 = vld [vmem:[%s3673_s6 + $0x1f0] sm:$0xff]  ;;  %v785_v21 = vld [vmem:[%s3194_s26 + $0x28] sm:$0xf]  ;;  %v835_v24 = vsel %vm3232_vm2, %v830_v15, %v834_v12  ;;  %v851_v26 = vshrl.u32 %v783_v20, 16  ;;  %v854_v27 = vshll.u32 %v783_v20, 16  ;;  %v2861_v32 = vld [vmem:[%s3673_s6 + $0x120] sm:$0xff] }
  0x2a   : > { %991 = vmatpush.bf16.msra.mxu2 %v2836_v25  ;;  %v2862_v22 = vld [vmem:[%s3673_s6 + $0x128] sm:$0xff]  ;;  %v849_v25 = vsel %vm3232_vm2, %v844_v16, %v848_v17  ;;  %v865_v28 = vshrl.u32 %v785_v21, 16  ;;  %v868_v29 = vshll.u32 %v785_v21, 16  ;;  %v2881_v33 = vld [vmem:[%s3673_s6 + $0x1a0] sm:$0xff]  ;;  %v2816_v41 = vld [vmem:[%s3673_s6 + $0x18] sm:$0xff] }
  0x2b   : > { %1125 = vmatpush.bf16.msra.mxu3 %v2848_v30  ;;  %v2882_v23 = vld [vmem:[%s3673_s6 + $0x1a8] sm:$0xff]  ;;  %v2817_v30 = vld [vmem:[%s3673_s6 + $0x20] sm:$0xff]  ;;  %v926_v35 = vunpack.c.l.b16 %v849_v25  ;;  %v853_v36 = vrot.slane %v851_v26, 4  ;;  %v856_v37 = vrot.slane %v854_v27, 5  ;;  %v2860_v44 = vld [vmem:[%s3673_s6 + $0x118] sm:$0xff] }
  0x2c   : > { %v867_v38 = vrot.slane %v865_v28, 4  ;;  %v784_v42 = vld [vmem:[%s3194_s26 + $0x24] sm:$0x1]  ;;  %v786_v43 = vld [vmem:[%s3194_s26 + $0x2c] sm:$0x1]  ;;  %v2815_v54 = vld [vmem:[%s3673_s6 + $0x10] sm:$0xff] }
  0x2d   : > { %2911 = vmatpush.bf16.msra.mxu1 %v2827_v31  ;;  %650 = vmatpush.bf16.msra.mxu0 %v2827_v31  ;;  %v2894_v31 = vld [vmem:[%s3673_s6 + $0x1e8] sm:$0xff]  ;;  %v2468_v48 = vld [vmem:[%s3270_s11 + $0x10] sm:$0xf]  ;;  %v857_v50 = vor.u32 %v856_v37, %v853_v36  ;;  %v860_v51 = vshll.u32 %v784_v42, 16  ;;  %v874_v53 = vshll.u32 %v786_v43, 16  ;;  %v2880_v57 = vld [vmem:[%s3673_s6 + $0x198] sm:$0xff] }
  0x2e   : > { %992 = vmatpush.bf16.msra.mxu2 %v2835_v34  ;;  %v925_v34 = vunpack.c.l.b16 %v835_v24  ;;  %v2814_v63 = vld [vmem:[%s3673_s6 + $0x8] sm:$0xff]  ;;  %v787_v2 = vld [vmem:[%s3194_s26 + $0x30] sm:$0xf]  ;;  %v789_v3 = vld [vmem:[%s3194_s26 + $0x38] sm:$0xf] }
  0x2f   : > { %1126 = vmatpush.bf16.msra.mxu3 %v2847_v40  ;;  %v870_v40 = vrot.slane %v868_v29, 5  ;;  %v858_v58 = vrot.slane %v857_v50, 4  ;;  %v2892_v4 = vld [vmem:[%s3673_s6 + $0x1d8] sm:$0xff]  ;;  %v2813_v7 = vld [vmem:[%s3673_s6] sm:$0xff]  ;;  %v879_v8 = vshrl.u32 %v787_v2, 16  ;;  %v2870_v36 = vld [vmem:[%s3673_s6 + $0x168] sm:$0xff] }
  0x30   : > { %v932_v47 = vpack.c.b16 %v926_v35, %v925_v34  ;;  %v2872_v12 = vld [vmem:[%s3673_s6 + $0x178] sm:$0xff]  ;;  %v2352_v15 = vld [vmem:[%s3194_s26] sm:$0xf]  ;;  %v2809_v16 = vld [vmem:[%s3194_s26 + $0x4] sm:$0xf0] }
  0x31   : > { %2912 = vmatpush.bf16.msra.mxu1 %v2826_v45  ;;  %651 = vmatpush.bf16.msra.mxu0 %v2826_v45  ;;  %v2824_v45 = vld [vmem:[%s3263_s21 + $0x18] sm:$0xff]  ;;  %v871_v52 = vor.u32 %v870_v40, %v867_v38  ;;  %v788_v24 = vld [vmem:[%s3194_s26 + $0x34] sm:$0x1]  ;;  %v2353_v26 = vor.u32 %v2809_v16, %v2352_v15  ;;  %v2472_v29 = vld [vmem:[%s3270_s11 + $0x20] sm:$0xf] }
  0x32   : > { %993 = vmatpush.bf16.msra.mxu2 %v2834_v46  ;;  %v2822_v46 = vld [vmem:[%s3263_s21 + $0x8] sm:$0xff]  ;;  %s3393_s21 = scalar_lea.vmem %s3670_s3, %s3243_s22  ;;  %v790_v25 = vld [vmem:[%s3194_s26 + $0x3c] sm:$0x1]  ;;  %v2891_v40 = vld [vmem:[%s3673_s6 + $0x1d0] sm:$0xff] }
  0x33   : > { %1127 = vmatpush.bf16.msra.mxu3 %v2846_v49  ;;  %v2842_v49 = vld [vmem:[%s3270_s11 + $0x14] sm:$0xf0]  ;;  %v2853_v27 = vld [vmem:[%s3393_s21] sm:$0xff]  ;;  %v902_v35 = vshll.u32 %v790_v25, 16  ;;  %v2878_v37 = vld [vmem:[%s3673_s6 + $0x188] sm:$0xff] }
  0x34   : > { %v2469_v56 = vor.u32 %v2842_v49, %v2468_v48  ;;  %v2890_v48 = vld [vmem:[%s3673_s6 + $0x1c8] sm:$0xff]  ;;  %v2901_v49 = vld [vmem:[%s3673_s6 + $0x220] sm:$0xff] }
  0x35   : > { %2913 = vmatpush.bf16.msra.mxu1 %v2825_v55  ;;  %652 = vmatpush.bf16.msra.mxu0 %v2825_v55  ;;  %v2859_v55 = vld [vmem:[%s3673_s6 + $0x110] sm:$0xff]  ;;  %v1294_v15 = vld [vmem:[%s3270_s11 + $0x8] sm:$0xf]  ;;  %v2897_v16 = vld [vmem:[%s3673_s6 + $0x200] sm:$0xff] }
  0x36   : > { %994 = vmatpush.bf16.msra.mxu2 %v2833_v60  ;;  %v872_v60 = vrot.slane %v871_v52, 4  ;;  %v2868_v52 = vld [vmem:[%s3673_s6 + $0x158] sm:$0xff] }
  0x37   : > { %1128 = vmatpush.bf16.msra.mxu3 %v2845_v6 }
  0x38   : > { %663 = vmatmul.bf16.vlgmr.msra.gmra.mxu1 %v2823_v0  ;;  %653 = vmatmul.bf16.vlgmr.msra.gmra.mxu0 %v2821_v1  ;;  %v2858_v0 = vld [vmem:[%s3673_s6 + $0x108] sm:$0xff]  ;;  %v2879_v1 = vld [vmem:[%s3673_s6 + $0x190] sm:$0xff] }
  0x39   : > { %746 = vmatpush.bf16.msrb.mxu1 %v2820_v59  ;;  %1255 = vmatpush.bf16.msrb.mxu0 %v2864_v61  ;;  %v862_v59 = vrot.slane %v860_v51, 5  ;;  %v876_v61 = vrot.slane %v874_v53, 5  ;;  %v2356_v53 = vld [vmem:[%s3194_s26 + $0x10] sm:$0xf] }
  0x3a   : > { %1635 = vmatpush.bf16.msrb.mxu2 %v2884_v62  ;;  %1129 = vmatmul.bf16.vlgmr.msra.gmra.mxu3 %v2465_v14  ;;  %v2893_v62 = vld [vmem:[%s3673_s6 + $0x1e0] sm:$0xff]  ;;  %v2904_v14 = vld [vmem:[%s3673_s6 + $0x238] sm:$0xff] }
  0x3b   : > { %995 = vmatmul.bf16.vlgmr.msra.gmra.mxu2 %v931_v5  ;;  %1769 = vmatpush.bf16.msrb.mxu3 %v2896_v10  ;;  %v863_v5 = vsel %vm3232_vm2, %v858_v58, %v862_v59  ;;  %v877_v6 = vsel %vm3232_vm2, %v872_v60, %v876_v61  ;;  %v893_v10 = vshrl.u32 %v789_v3, 16  ;;  %v2854_v59 = vld [vmem:[%s3393_s21 + $0x8] sm:$0xff]  ;;  %v2476_v61 = vld [vmem:[%s3270_s11 + $0x30] sm:$0xf] }
  0x3c   : > { %v927_v17 = vunpack.c.l.b16 %v863_v5  ;;  %v2898_v5 = vld [vmem:[%s3673_s6 + $0x208] sm:$0xff] }
  0x3d   : > { %747 = vmatpush.bf16.msrb.mxu1 %v2819_v9  ;;  %1256 = vmatpush.bf16.msrb.mxu0 %v2863_v11  ;;  %v882_v9 = vshll.u32 %v787_v2, 16  ;;  %v896_v11 = vshll.u32 %v789_v3, 16  ;;  %v895_v21 = vrot.slane %v893_v10, 4  ;;  %v2900_v2 = vld [vmem:[%s3673_s6 + $0x218] sm:$0xff]  ;;  %v2865_v3 = vld [vmem:[%s3673_s6 + $0x140] sm:$0xff] }
  0x3e   : > { %1636 = vmatpush.bf16.msrb.mxu2 %v2883_v13  ;;  %v2857_v13 = vld [vmem:[%s3673_s6 + $0x100] sm:$0xff] }
  0x3f   : > { %1770 = vmatpush.bf16.msrb.mxu3 %v2895_v19  ;;  %v881_v19 = vrot.slane %v879_v8, 4  ;;  %v884_v20 = vrot.slane %v882_v9, 5  ;;  %v2640_v8 = vld [vmem:[%s3464_s0] sm:$0xf]  ;;  %v2873_v9 = vld [vmem:[%s3464_s0 + $0x4] sm:$0xf0] }
  0x41   : > { %748 = vmatpush.bf16.msrb.mxu1 %v2818_v18  ;;  %1257 = vmatpush.bf16.msrb.mxu0 %v2862_v22  ;;  %v928_v18 = vunpack.c.l.b16 %v877_v6  ;;  %v898_v22 = vrot.slane %v896_v11, 5  ;;  %v2360_v6 = vld [vmem:[%s3194_s26 + $0x20] sm:$0xf]  ;;  %v2855_v11 = vld [vmem:[%s3393_s21 + $0x10] sm:$0xff] }
  0x42   : > { %1637 = vmatpush.bf16.msrb.mxu2 %v2882_v23  ;;  %v2871_v23 = vld [vmem:[%s3673_s6 + $0x170] sm:$0xff] }
  0x43   : > { %1771 = vmatpush.bf16.msrb.mxu3 %v2894_v31  ;;  %v933_v28 = vpack.c.b16 %v928_v18, %v927_v17  ;;  %v2903_v31 = vld [vmem:[%s3673_s6 + $0x230] sm:$0xff]  ;;  %v899_v34 = vor.u32 %v898_v22, %v895_v21  ;;  %v1806_v17 = vld [vmem:[%s3464_s0] sm:$0xf]  ;;  %v1808_v18 = vld [vmem:[%s3464_s0 + $0x8] sm:$0xf]  ;;  %v1323_v21 = vshrl.u32 %v1294_v15, 16 }
  0x44   : > { %v1326_v22 = vshll.u32 %v1294_v15, 16  ;;  %v1837_v25 = vshrl.u32 %v1808_v18, 16 }
  0x45   : > { %749 = vmatpush.bf16.msrb.mxu1 %v2817_v30  ;;  %1258 = vmatpush.bf16.msrb.mxu0 %v2861_v32  ;;  %v2843_v30 = vld [vmem:[%s3270_s11 + $0x24] sm:$0xf0]  ;;  %v885_v32 = vor.u32 %v884_v20, %v881_v19  ;;  %v900_v43 = vrot.slane %v899_v34, 4  ;;  %v2812_v34 = vld [vmem:[%s3194_s26 + $0x34] sm:$0xf0] }
  0x46   : > { %1638 = vmatpush.bf16.msrb.mxu2 %v2881_v33  ;;  %v888_v33 = vshll.u32 %v788_v24, 16  ;;  %v2473_v38 = vor.u32 %v2843_v30, %v2472_v29  ;;  %v1826_v24 = vshll.u32 %v1806_v17, 16  ;;  %v1295_v29 = vld [vmem:[%s3270_s11 + $0xc] sm:$0x1] }
  0x47   : > { %1772 = vmatpush.bf16.msrb.mxu3 %v2893_v62  ;;  %v2844_v62 = vld [vmem:[%s3270_s11 + $0x34] sm:$0xf0] }
  0x48   : > { %668 = vmatmul.bf16.gmra.mxu1 %v2824_v45  ;;  %658 = vmatmul.bf16.gmra.mxu0 %v2822_v46  ;;  %v890_v42 = vrot.slane %v888_v33, 5  ;;  %v2877_v45 = vld [vmem:[%s3673_s6 + $0x180] sm:$0xff]  ;;  %v2902_v46 = vld [vmem:[%s3673_s6 + $0x228] sm:$0xff]  ;;  %v1328_v33 = vrot.slane %v1326_v22, 5 }
  0x49   : > { %750 = vmatpush.bf16.msrb.mxu1 %v2816_v41  ;;  %1259 = vmatpush.bf16.msrb.mxu0 %v2860_v44  ;;  %v886_v41 = vrot.slane %v885_v32, 4  ;;  %v904_v44 = vrot.slane %v902_v35, 5  ;;  %v1325_v32 = vrot.slane %v1323_v21, 4  ;;  %v1299_v21 = vld [vmem:[%s3270_s11 + $0x1c] sm:$0x1] }
  0x4a   : > { %1639 = vmatpush.bf16.msrb.mxu2 %v2880_v57  ;;  %1134 = vmatmul.bf16.gmra.mxu3 %v2469_v56  ;;  %v2867_v57 = vld [vmem:[%s3673_s6 + $0x150] sm:$0xff] }
  0x4b   : > { %1000 = vmatmul.bf16.gmra.mxu2 %v932_v47  ;;  %1773 = vmatpush.bf16.msrb.mxu3 %v2892_v4  ;;  %v2869_v47 = vld [vmem:[%s3673_s6 + $0x160] sm:$0xff]  ;;  %v891_v50 = vsel %vm3232_vm2, %v886_v41, %v890_v42  ;;  %v905_v51 = vsel %vm3232_vm2, %v900_v43, %v904_v44  ;;  %v2899_v4 = vld [vmem:[%s3673_s6 + $0x210] sm:$0xff]  ;;  %v1809_v41 = vld [vmem:[%s3464_s0 + $0xc] sm:$0x1] }
  0x4c   : > { %v930_v56 = vunpack.c.l.b16 %v905_v51  ;;  %v2644_v42 = vld [vmem:[%s3464_s0 + $0x10] sm:$0xf]  ;;  %v2874_v43 = vld [vmem:[%s3464_s0 + $0x14] sm:$0xf0] }
  0x4d   : > { %751 = vmatpush.bf16.msrb.mxu1 %v2815_v54  ;;  %1260 = vmatpush.bf16.msrb.mxu0 %v2859_v55  ;;  %v2810_v54 = vld [vmem:[%s3194_s26 + $0x14] sm:$0xf0]  ;;  %v929_v55 = vunpack.c.l.b16 %v891_v50 }
  0x4e   : > { %1640 = vmatpush.bf16.msrb.mxu2 %v2879_v1  ;;  %v2357_v58 = vor.u32 %v2810_v54, %v2356_v53  ;;  %v2889_v1 = vld [vmem:[%s3673_s6 + $0x1c0] sm:$0xff]  ;;  %v1846_v53 = vshll.u32 %v1809_v41, 16  ;;  %v2645_v54 = vor.u32 %v2874_v43, %v2644_v42 }
  0x4f   : > { %1774 = vmatpush.bf16.msrb.mxu3 %v2891_v40  ;;  %v934_v60 = vpack.c.b16 %v930_v56, %v929_v55  ;;  %v1807_v40 = vld [vmem:[%s3464_s0 + $0x4] sm:$0x1] }
  0x50   : > { %v1832_v51 = vshll.u32 %v1807_v40, 16 }
  0x51   : > { %752 = vmatpush.bf16.msrb.mxu1 %v2814_v63  ;;  %1261 = vmatpush.bf16.msrb.mxu0 %v2858_v0  ;;  %v2477_v63 = vor.u32 %v2844_v62, %v2476_v61  ;;  %v2866_v0 = vld [vmem:[%s3673_s6 + $0x148] sm:$0xff]  ;;  %v1810_v61 = vld [vmem:[%s3464_s0 + $0x10] sm:$0xf]  ;;  %v1812_v62 = vld [vmem:[%s3464_s0 + $0x18] sm:$0xf] }
  0x52   : > { %1641 = vmatpush.bf16.msrb.mxu2 %v2878_v37  ;;  %v1839_v37 = vrot.slane %v1837_v25, 4 }
  0x53   : > { %1775 = vmatpush.bf16.msrb.mxu3 %v2890_v48  ;;  %v1329_v48 = vor.u32 %v1328_v33, %v1325_v32  ;;  %v2648_v32 = vld [vmem:[%s3464_s0 + $0x20] sm:$0xf]  ;;  %v2875_v33 = vld [vmem:[%s3464_s0 + $0x24] sm:$0xf0] }
  0x55   : > { %753 = vmatpush.bf16.msrb.mxu1 %v2813_v7  ;;  %1262 = vmatpush.bf16.msrb.mxu0 %v2857_v13  ;;  %v2811_v7 = vld [vmem:[%s3194_s26 + $0x24] sm:$0xf0]  ;;  %v2885_v13 = vld [vmem:[%s3478_s13] sm:$0xff] }
  0x56   : > { %1642 = vmatpush.bf16.msrb.mxu2 %v2877_v45  ;;  %v2361_v10 = vor.u32 %v2811_v7, %v2360_v6  ;;  %v1332_v45 = vshll.u32 %v1295_v29, 16 }
  0x57   : > { %1776 = vmatpush.bf16.msrb.mxu3 %v2889_v1  ;;  %v1834_v1 = vrot.slane %v1832_v51, 5 }
  0x58   : > { %754 = vmatmul.bf16.vlgmr.msrb.gmra.mxu1 %v2353_v26  ;;  %1263 = vmatmul.bf16.vlgmr.msrb.gmra.mxu0 %v2853_v27  ;;  %v1840_v26 = vshll.u32 %v1808_v18, 16  ;;  %v2364_v27 = vld [vmem:[%s3194_s26 + $0x30] sm:$0xf]  ;;  %v1334_v56 = vrot.slane %v1332_v45, 5  ;;  %v2649_v45 = vor.u32 %v2875_v33, %v2648_v32  ;;  %s457_s26 = sand.u32 1, %s3042_s28  }
  0x59   : > { %1501 = vmatpush.bf16.msra.mxu1 %v2872_v12  ;;  %2015 = vmatpush.bf16.msra.mxu0 %v2904_v14  ;;  %v2641_v12 = vor.u32 %v2873_v9, %v2640_v8  ;;  %v1851_v8 = vshrl.u32 %v1810_v61, 16  ;;  %v1854_v9 = vshll.u32 %v1810_v61, 16  ;;  %s2273_s22 = sshll.u32 %s457_s26, 6  ;;  %s2073_s30 = scalar_lea.sflag [#allocation3], %s457_s26 }
  0x5a   : > { %1139 = vmatmul.bf16.gmra.mxu3 %v2473_v38  ;;  %2914 = vmatpush.bf16.msra.mxu2 %v2904_v14  ;;  %v1292_v14 = vld [vmem:[%s3270_s11] sm:$0xf]  ;;  %v1842_v38 = vrot.slane %v1840_v26, 5  ;;  %v1811_v26 = vld [vmem:[%s3464_s0 + $0x14] sm:$0x1]  ;;  %s3598_s14 = scalar_lea.vmem [#allocation2], %s2273_s22 }
  0x5b   : > { %1005 = vmatmul.bf16.gmra.mxu2 %v933_v28  ;;  %v1309_v19 = vshrl.u32 %v1292_v14, 16  ;;  %v1312_v20 = vshll.u32 %v1292_v14, 16  ;;  %v1293_v28 = vld [vmem:[%s3270_s11 + $0x4] sm:$0x1]  ;;  %v1853_v22 = vrot.slane %v1851_v8, 4  ;;  %v1860_v40 = vshll.u32 %v1811_v26, 16 }
  0x5c   : > { %v1318_v44 = vshll.u32 %v1293_v28, 16  ;;  %s2087_s24 = sshll.u32 %s3598_s14, 4  ;;  %s3000_s22 = scalar_lea.hbm %s3675_s8, 128  ;;  %s2088_s24 = int_to_ptr.vmem [resolvable:$true] %s2087_s24 }
  0x5d   : > { %1502 = vmatpush.bf16.msra.mxu1 %v2871_v23  ;;  %2016 = vmatpush.bf16.msra.mxu0 %v2903_v31  ;;  %v1823_v23 = vshrl.u32 %v1806_v17, 16  ;;  %v1311_v30 = vrot.slane %v1309_v19, 4  ;;  %v1862_v51 = vrot.slane %v1860_v40, 5 }
  0x5e   : > { %2915 = vmatpush.bf16.msra.mxu2 %v2903_v31  ;;  %v1314_v31 = vrot.slane %v1312_v20, 5  ;;  %v1320_v55 = vrot.slane %v1318_v44, 5 }
  0x5f   : > { %v1825_v35 = vrot.slane %v1823_v23, 4  ;;  %v1856_v23 = vrot.slane %v1854_v9, 5 }
  0x61   : > { %1503 = vmatpush.bf16.msra.mxu1 %v2870_v36  ;;  %2017 = vmatpush.bf16.msra.mxu0 %v2902_v46  ;;  %v1828_v36 = vrot.slane %v1826_v24, 5 }
  0x62   : > { %2916 = vmatpush.bf16.msra.mxu2 %v2902_v46  ;;  %v2365_v46 = vor.u32 %v2812_v34, %v2364_v27  ;;  %v1813_v27 = vld [vmem:[%s3464_s0 + $0x1c] sm:$0x1] }
  0x63   : > { %v1829_v50 = vor.u32 %v1828_v36, %v1825_v35  ;;  %v1874_v42 = vshll.u32 %v1813_v27, 16 }
  0x65   : > { %1504 = vmatpush.bf16.msra.mxu1 %v2869_v47  ;;  %2018 = vmatpush.bf16.msra.mxu0 %v2901_v49  ;;  %v1315_v47 = vor.u32 %v1314_v31, %v1311_v30 }
  0x66   : > { %2917 = vmatpush.bf16.msra.mxu2 %v2901_v49  ;;  %v2856_v49 = vld [vmem:[%s3393_s21 + $0x18] sm:$0xff] }
  0x68   : > { %759 = vmatmul.bf16.gmra.mxu1 %v2357_v58  ;;  %1268 = vmatmul.bf16.gmra.mxu0 %v2854_v59  ;;  %v1298_v58 = vld [vmem:[%s3270_s11 + $0x18] sm:$0xf]  ;;  %v1316_v59 = vrot.slane %v1315_v47, 4 }
  0x69   : > { %1505 = vmatpush.bf16.msra.mxu1 %v2868_v52  ;;  %2019 = vmatpush.bf16.msra.mxu0 %v2900_v2  ;;  %v1843_v52 = vor.u32 %v1842_v38, %v1839_v37  ;;  %v1351_v6 = vshrl.u32 %v1298_v58, 16  ;;  %v1354_v7 = vshll.u32 %v1298_v58, 16  ;;  %v1360_v37 = vshll.u32 %v1299_v21, 16  ;;  %v1816_v58 = vld [vmem:[%s3464_s0 + $0x28] sm:$0xf] }
  0x6a   : > { %1144 = vmatmul.bf16.gmra.mxu3 %v2477_v63  ;;  %2918 = vmatpush.bf16.msra.mxu2 %v2900_v2  ;;  %v2886_v63 = vld [vmem:[%s3478_s13 + $0x8] sm:$0xff]  ;;  %v1857_v38 = vor.u32 %v1856_v23, %v1853_v22  ;;  %v1896_v8 = vshll.u32 %v1816_v58, 16  ;;  %v2652_v22 = vld [vmem:[%s3464_s0 + $0x30] sm:$0xf] }
  0x6b   : > { %1010 = vmatmul.bf16.gmra.mxu2 %v934_v60  ;;  %v1330_v60 = vrot.slane %v1329_v48, 4  ;;  %v1844_v2 = vrot.slane %v1843_v52, 4  ;;  %v1353_v19 = vrot.slane %v1351_v6, 4  ;;  %v1356_v20 = vrot.slane %v1354_v7, 5  ;;  %v1303_v23 = vld [vmem:[%s3270_s11 + $0x2c] sm:$0x1] }
  0x6c   : > { %v1893_v7 = vshrl.u32 %v1816_v58, 16  ;;  %v1898_v27 = vrot.slane %v1896_v8, 5 }
  0x6d   : > { %1506 = vmatpush.bf16.msra.mxu1 %v2867_v57  ;;  %2020 = vmatpush.bf16.msra.mxu0 %v2899_v4  ;;  %v1296_v57 = vld [vmem:[%s3270_s11 + $0x10] sm:$0xf]  ;;  %v1357_v36 = vor.u32 %v1356_v20, %v1353_v19 }
  0x6e   : > { %2919 = vmatpush.bf16.msra.mxu2 %v2899_v4  ;;  %v1337_v4 = vshrl.u32 %v1296_v57, 16  ;;  %v1895_v26 = vrot.slane %v1893_v7, 4 }
  0x6f   : > { %v1358_v48 = vrot.slane %v1357_v36, 4 }
  0x70   : > { %v1339_v17 = vrot.slane %v1337_v4, 4  ;;  %v1820_v4 = vld [vmem:[%s3464_s0 + $0x38] sm:$0xf] }
  0x71   : > { %1507 = vmatpush.bf16.msra.mxu1 %v2866_v0  ;;  %2021 = vmatpush.bf16.msra.mxu0 %v2898_v5  ;;  %v1830_v0 = vrot.slane %v1829_v50, 4  ;;  %v1858_v50 = vrot.slane %v1857_v38, 4 }
  0x72   : > { %2920 = vmatpush.bf16.msra.mxu2 %v2898_v5  ;;  %v1340_v5 = vshll.u32 %v1296_v57, 16  ;;  %v1814_v57 = vld [vmem:[%s3464_s0 + $0x20] sm:$0xf] }
  0x73   : > { %v1835_v14 = vsel %vm3232_vm2, %v1830_v0, %v1834_v1  ;;  %v1863_v61 = vsel %vm3232_vm2, %v1858_v50, %v1862_v51  ;;  %v1882_v6 = vshll.u32 %v1814_v57, 16 }
  0x74   : > { %v1342_v18 = vrot.slane %v1340_v5, 5  ;;  %v1951_v30 = vunpack.c.l.b16 %v1835_v14  ;;  %v1879_v5 = vshrl.u32 %v1814_v57, 16  ;;  %v2888_v57 = vld [vmem:[%s3478_s13 + $0x18] sm:$0xff] }
  0x75   : > { %1508 = vmatpush.bf16.msra.mxu1 %v2865_v3  ;;  %2022 = vmatpush.bf16.msra.mxu0 %v2897_v16  ;;  %v1848_v3 = vrot.slane %v1846_v53, 5  ;;  %v1876_v53 = vrot.slane %v1874_v42, 5  ;;  %v1388_v42 = vshll.u32 %v1303_v23, 16 }
  0x76   : > { %2921 = vmatpush.bf16.msra.mxu2 %v2897_v16  ;;  %v1297_v16 = vld [vmem:[%s3270_s11 + $0x14] sm:$0x1]  ;;  %v1343_v34 = vor.u32 %v1342_v18, %v1339_v17  ;;  %v1301_v17 = vld [vmem:[%s3270_s11 + $0x24] sm:$0x1] }
  0x77   : > { %v1849_v15 = vsel %vm3232_vm2, %v1844_v2, %v1848_v3  ;;  %v1346_v35 = vshll.u32 %v1297_v16, 16  ;;  %v1924_v16 = vshll.u32 %v1820_v4, 16  ;;  %v1374_v40 = vshll.u32 %v1301_v17, 16 }
  0x78   : > { %764 = vmatmul.bf16.gmra.mxu1 %v2361_v10  ;;  %1273 = vmatmul.bf16.gmra.mxu0 %v2855_v11  ;;  %v1865_v10 = vshrl.u32 %v1812_v62, 16  ;;  %v1868_v11 = vshll.u32 %v1812_v62, 16  ;;  %v1952_v31 = vunpack.c.l.b16 %v1849_v15  ;;  %v1921_v15 = vshrl.u32 %v1820_v4, 16 }
  0x79   : > { %v1348_v47 = vrot.slane %v1346_v35, 5  ;;  %v1819_v35 = vld [vmem:[%s3464_s0 + $0x34] sm:$0x1] }
  0x7a   : > { %1777 = vmatmul.bf16.vlgmr.msrb.gmra.mxu3 %v2885_v13  ;;  %v1335_v13 = vsel %vm3232_vm2, %v1330_v60, %v1334_v56  ;;  %v1867_v24 = vrot.slane %v1865_v10, 4  ;;  %v1870_v25 = vrot.slane %v1868_v11, 5  ;;  %v1959_v44 = vpack.c.b16 %v1952_v31, %v1951_v30  ;;  %v1302_v56 = vld [vmem:[%s3270_s11 + $0x28] sm:$0xf] }
  0x7b   : > { %1643 = vmatmul.bf16.vlgmr.msrb.gmra.mxu2 %v2641_v12  ;;  %v1321_v12 = vsel %vm3232_vm2, %v1316_v59, %v1320_v55  ;;  %v1438_v29 = vunpack.c.l.b16 %v1335_v13  ;;  %v1300_v55 = vld [vmem:[%s3270_s11 + $0x20] sm:$0xf]  ;;  %v1379_v2 = vshrl.u32 %v1302_v56, 16  ;;  %v1382_v3 = vshll.u32 %v1302_v56, 16 }
  0x7c   : > { %v1437_v28 = vunpack.c.l.b16 %v1321_v12  ;;  %v1871_v41 = vor.u32 %v1870_v25, %v1867_v24  ;;  %v1365_v0 = vshrl.u32 %v1300_v55, 16  ;;  %v1368_v1 = vshll.u32 %v1300_v55, 16 }
  0x7d   : > { %v1953_v13 = vunpack.c.l.b16 %v1863_v61  ;;  %v1381_v20 = vrot.slane %v1379_v2, 4  ;;  %v1384_v21 = vrot.slane %v1382_v3, 5  ;;  %v1881_v24 = vrot.slane %v1879_v5, 4  ;;  %v1306_v3 = vld [vmem:[%s3270_s11 + $0x38] sm:$0xf] }
  0x7e   : > { %v1445_v43 = vpack.c.b16 %v1438_v29, %v1437_v28  ;;  %v1872_v52 = vrot.slane %v1871_v41, 4  ;;  %v1367_v18 = vrot.slane %v1365_v0, 4  ;;  %v1370_v19 = vrot.slane %v1368_v1, 5  ;;  %v1815_v28 = vld [vmem:[%s3464_s0 + $0x24] sm:$0x1] }
  0x7f   : > { %v1884_v25 = vrot.slane %v1882_v6, 5  ;;  %v1817_v29 = vld [vmem:[%s3464_s0 + $0x2c] sm:$0x1]  ;;  %v1923_v36 = vrot.slane %v1921_v15, 4  ;;  %v1385_v41 = vor.u32 %v1384_v21, %v1381_v20  ;;  %v1916_v50 = vshll.u32 %v1819_v35, 16 }
  0x80   : > { %v1877_v62 = vsel %vm3232_vm2, %v1872_v52, %v1876_v53  ;;  %v1371_v38 = vor.u32 %v1370_v19, %v1367_v18  ;;  %v1390_v56 = vrot.slane %v1388_v42, 5  ;;  %v1304_v0 = vld [vmem:[%s3270_s11 + $0x30] sm:$0xf]  ;;  %v1305_v21 = vld [vmem:[%s3270_s11 + $0x34] sm:$0x1] }
  0x81   : > { %v1954_v14 = vunpack.c.l.b16 %v1877_v62  ;;  %v1386_v55 = vrot.slane %v1385_v41, 4  ;;  %v1393_v8 = vshrl.u32 %v1304_v0, 16 }
  0x82   : > { %v1372_v53 = vrot.slane %v1371_v38, 4 }
  0x83   : > { %v1960_v33 = vpack.c.b16 %v1954_v14, %v1953_v13  ;;  %v1391_v5 = vsel %vm3232_vm2, %v1386_v55, %v1390_v56  ;;  %v1395_v19 = vrot.slane %v1393_v8, 4 }
  0x84   : > { %v1442_v15 = vunpack.c.l.b16 %v1391_v5 }
  0x88   : > { %769 = vmatmul.bf16.gmra.mxu1 %v2365_v46  ;;  %1278 = vmatmul.bf16.gmra.mxu0 %v2856_v49  ;;  %v1344_v46 = vrot.slane %v1343_v34, 4  ;;  %v1362_v49 = vrot.slane %v1360_v37, 5  ;;  %v2876_v34 = vld [vmem:[%s3464_s0 + $0x34] sm:$0xf0]  ;;  %v1926_v37 = vrot.slane %v1924_v16, 5 }
  0x8a   : > { %1782 = vmatmul.bf16.gmra.mxu3 %v2886_v63  ;;  %v1349_v59 = vsel %vm3232_vm2, %v1344_v46, %v1348_v47  ;;  %v1363_v60 = vsel %vm3232_vm2, %v1358_v48, %v1362_v49  ;;  %v1818_v63 = vld [vmem:[%s3464_s0 + $0x30] sm:$0xf]  ;;  %v1899_v46 = vor.u32 %v1898_v27, %v1895_v26  ;;  %v1902_v47 = vshll.u32 %v1817_v29, 16 }
  0x8b   : > { %1648 = vmatmul.bf16.gmra.mxu2 %v2645_v54  ;;  %v2887_v54 = vld [vmem:[%s3478_s13 + $0x10] sm:$0xff]  ;;  %v1439_v9 = vunpack.c.l.b16 %v1349_v59  ;;  %v1440_v10 = vunpack.c.l.b16 %v1363_v60  ;;  %v1907_v11 = vshrl.u32 %v1818_v63, 16  ;;  %v1910_v12 = vshll.u32 %v1818_v63, 16  ;;  %s2996_s13 = scalar_lea.hbm %s2995_s1, 64 }
  0x8c   : > { %v2653_v48 = vor.u32 %v2876_v34, %v2652_v22  ;;  %v1927_v51 = vor.u32 %v1926_v37, %v1923_v36  ;;  %v1900_v60 = vrot.slane %v1899_v46, 4  ;;  %v1904_v61 = vrot.slane %v1902_v47, 5  ;;  %p2997_p12 = scmp.ne.s32.totalorder %s2995_s1, %s2996_s13  ;;  %p3002_p2 = scmp.lt.s32.totalorder %s3000_s22, %s2996_s13 }
  0x8d   : > { %v1909_v30 = vrot.slane %v1907_v11, 4  ;;  %v1912_v31 = vrot.slane %v1910_v12, 5  ;;  %v1446_v32 = vpack.c.b16 %v1440_v10, %v1439_v9  ;;  %v1918_v63 = vrot.slane %v1916_v50, 5 }
  0x8e   : > { %v1928_v1 = vrot.slane %v1927_v51, 4  ;;  %v1905_v7 = vsel %vm3232_vm2, %v1900_v60, %v1904_v61  ;;  %v1396_v10 = vshll.u32 %v1304_v0, 16  ;;  %v1407_v11 = vshrl.u32 %v1306_v3, 16  ;;  %p2998_p13 = pnand %p2997_p12, %p3147_p4  ;;  %p3003_p3 = por %p3002_p2, %p3001_p1 }
  0x8f   : > { %v1913_v49 = vor.u32 %v1912_v31, %v1909_v30  ;;  %v1410_v12 = vshll.u32 %v1306_v3, 16  ;;  %v1956_v17 = vunpack.c.l.b16 %v1905_v7 }
  0x90   : > { %v1398_v22 = vrot.slane %v1396_v10, 5  ;;  %v1409_v23 = vrot.slane %v1407_v11, 4  ;;  %p2999_p0 = pneg %p2998_p13 }
  0x91   : > { %v1914_v62 = vrot.slane %v1913_v49, 4 }
  0x92   : > { %p3004_p5 = pnand %p3003_p3, %p2999_p0 }
  0x93   : > { %v1919_v9 = vsel %vm3232_vm2, %v1914_v62, %v1918_v63 }
  0x94   : > { %v1957_v18 = vunpack.c.l.b16 %v1919_v9 }
  0x98   : > { %1509 = vmatmul.bf16.vlgmr.msra.gmra.mxu1 %v1445_v43  ;;  %2023 = vmatmul.bf16.vlgmr.msra.gmra.mxu0 %v1959_v44  ;;  %v1821_v43 = vld [vmem:[%s3464_s0 + $0x3c] sm:$0x1]  ;;  %v1885_v44 = vor.u32 %v1884_v25, %v1881_v24  ;;  %v1412_v24 = vrot.slane %v1410_v12, 5 }
  0x99   : > { %v1930_v52 = vshll.u32 %v1821_v43, 16  ;;  %v1307_v25 = vld [vmem:[%s3270_s11 + $0x3c] sm:$0x1] }
  0x9a   : > { %1787 = vmatmul.bf16.gmra.mxu3 %v2887_v54  ;;  %v1376_v54 = vrot.slane %v1374_v40, 5  ;;  %v1886_v58 = vrot.slane %v1885_v44, 4  ;;  %v1416_v34 = vshll.u32 %v1307_v25, 16 }
  0x9b   : > { %1653 = vmatmul.bf16.gmra.mxu2 %v2649_v45  ;;  %v1888_v45 = vshll.u32 %v1815_v28, 16  ;;  %v1932_v2 = vrot.slane %v1930_v52, 5  ;;  %v1402_v28 = vshll.u32 %v1305_v21, 16 }
  0x9c   : > { %v1377_v4 = vsel %vm3232_vm2, %v1372_v53, %v1376_v54  ;;  %v1418_v38 = vrot.slane %v1416_v34, 5 }
  0x9d   : > { %v1890_v59 = vrot.slane %v1888_v45, 5  ;;  %v1933_v13 = vsel %vm3232_vm2, %v1928_v1, %v1932_v2  ;;  %v1441_v14 = vunpack.c.l.b16 %v1377_v4  ;;  %v1404_v36 = vrot.slane %v1402_v28, 5 }
  0x9e   : > { %v1958_v20 = vunpack.c.l.b16 %v1933_v13 }
  0x9f   : > { %v1891_v6 = vsel %vm3232_vm2, %v1886_v58, %v1890_v59  ;;  %v1447_v26 = vpack.c.b16 %v1442_v15, %v1441_v14 }
  0xa0   : > { %v1955_v16 = vunpack.c.l.b16 %v1891_v6  ;;  %v1962_v31 = vpack.c.b16 %v1958_v20, %v1957_v18 }
  0xa2   : > { %v1961_v27 = vpack.c.b16 %v1956_v17, %v1955_v16 }
  0xa8   : > { %1514 = vmatmul.bf16.gmra.mxu1 %v1446_v32  ;;  %2028 = vmatmul.bf16.gmra.mxu0 %v1960_v33  ;;  %v1399_v32 = vor.u32 %v1398_v22, %v1395_v19  ;;  %v1413_v33 = vor.u32 %v1412_v24, %v1409_v23 }
  0xaa   : > { %1792 = vmatmul.bf16.gmra.mxu3 %v2888_v57  ;;  %v1400_v35 = vrot.slane %v1399_v32, 4  ;;  %v1414_v37 = vrot.slane %v1413_v33, 4 }
  0xab   : > { %1658 = vmatmul.bf16.gmra.mxu2 %v2653_v48 }
  0xac   : > { %v1405_v43 = vsel %vm3232_vm2, %v1400_v35, %v1404_v36  ;;  %v1419_v44 = vsel %vm3232_vm2, %v1414_v37, %v1418_v38 }
  0xad   : > { %v1443_v46 = vunpack.c.l.b16 %v1405_v43  ;;  %v1444_v47 = vunpack.c.l.b16 %v1419_v44 }
  0xaf   : > { %v1448_v48 = vpack.c.b16 %v1444_v47, %v1443_v46 }
  0xb5   : > { %v664_v29 = vpop.f32.mrf.mxu1  ;;  %v654_v30 = vpop.f32.mrf.mxu0 }
  0xb8   : > { %1519 = vmatmul.bf16.gmra.mxu1 %v1447_v26  ;;  %2033 = vmatmul.bf16.gmra.mxu0 %v1961_v27 }
  0xbb   : > { %2038 = vmatmul.bf16.vlgmr.msra.gmra.mxu2 %v1962_v31 }
  0xbd   : > { %v666_v41 = vpop.f32.mrf.mxu1  ;;  %v656_v42 = vpop.f32.mrf.mxu0 }
  0xbe   : > { %v996_v40 = vpop.f32.mrf.mxu2  ;;  %v1130_v45 = vpop.f32.mrf.mxu3 }
  0xc5   : > { %v669_v50 = vpop.f32.mrf.mxu1  ;;  %v659_v51 = vpop.f32.mrf.mxu0 }
  0xc6   : > { %v998_v49 = vpop.f32.mrf.mxu2  ;;  %v1132_v52 = vpop.f32.mrf.mxu3 }
  0xc8   : > { %1524 = vmatmul.bf16.gmra.mxu1 %v1448_v48 }
  0xcd   : > { %v671_v54 = vpop.f32.mrf.mxu1  ;;  %v661_v55 = vpop.f32.mrf.mxu0 }
  0xce   : > { %v1001_v53 = vpop.f32.mrf.mxu2  ;;  %v3560_v56 = vpop.f32.mrf.mxu3 }
  0xd5   : > { %v755_v58 = vpop.f32.mrf.mxu1  ;;  %v1264_v59 = vpop.f32.mrf.mxu0 }
  0xd6   : > { %v1003_v57 = vpop.f32.mrf.mxu2  ;;  %v756_v60 = vadd.f32 %v755_v58, %v654_v30  ;;  %v3562_v61 = vpop.f32.mrf.mxu3 }
  0xd8   : > { %v1016_v39 = vadd.f32 %v996_v40, %v756_v60 }
  0xda   : > { %v1150_v37 = vadd.f32 %v1130_v45, %v1016_v39 }
  0xdc   : > { %v1284_v40 = vadd.f32 %v1264_v59, %v1150_v37 }
  0xdd   : > { %v757_v63 = vpop.f32.mrf.mxu1  ;;  %v1266_v0 = vpop.f32.mrf.mxu0 }
  0xde   : > { %v1006_v62 = vpop.f32.mrf.mxu2  ;;  %v758_v1 = vadd.f32 %v757_v63, %v656_v42  ;;  %v3564_v3 = vpop.f32.mrf.mxu3 }
  0xe0   : > { %v1017_v2 = vadd.f32 %v998_v49, %v758_v1 }
  0xe2   : > { %v1151_v47 = vadd.f32 %v1132_v52, %v1017_v2 }
  0xe4   : > { %v1285_v45 = vadd.f32 %v1266_v0, %v1151_v47 }
  0xe5   : > { %v760_v5 = vpop.f32.mrf.mxu1  ;;  %v1269_v6 = vpop.f32.mrf.mxu0 }
  0xe6   : > { %v1008_v4 = vpop.f32.mrf.mxu2  ;;  %v761_v7 = vadd.f32 %v760_v5, %v659_v51  ;;  %v3566_v10 = vpop.f32.mrf.mxu3 }
  0xe8   : > { %v1018_v8 = vadd.f32 %v1001_v53, %v761_v7 }
  0xea   : > { %v1152_v59 = vadd.f32 %v3560_v56, %v1018_v8 }
  0xed   : > { %v762_v11 = vpop.f32.mrf.mxu1  ;;  %v3568_v12 = vpop.f32.mrf.mxu0 }
  0xee   : > { %v1011_v9 = vpop.f32.mrf.mxu2  ;;  %v763_v13 = vadd.f32 %v762_v11, %v661_v55  ;;  %v3572_v19 = vpop.f32.mrf.mxu3 }
  0xf0   : > { %v1019_v14 = vadd.f32 %v1003_v57, %v763_v13 }
  0xf2   : > { %v1153_v5 = vadd.f32 %v3562_v61, %v1019_v14 }
  0xf4   : > { %v1287_v11 = vadd.f32 %v3568_v12, %v1153_v5 }
  0xf5   : > { %v765_v16 = vpop.f32.mrf.mxu1  ;;  %v3570_v17 = vpop.f32.mrf.mxu0 }
  0xf6   : > { %v1013_v15 = vpop.f32.mrf.mxu2  ;;  %v766_v18 = vadd.f32 %v765_v16, %v664_v29  ;;  %v3578_v26 = vpop.f32.mrf.mxu3 }
  0xf8   : > { %v1020_v20 = vadd.f32 %v1006_v62, %v766_v18  ;;  %v1286_v62 = vadd.f32 %v1269_v6, %v1152_v59 }
  0xfd   : > { %v767_v22 = vpop.f32.mrf.mxu1  ;;  %v3574_v23 = vpop.f32.mrf.mxu0 }
  0xfe   : > { %v1644_v21 = vpop.f32.mrf.mxu2  ;;  %v768_v24 = vadd.f32 %v767_v22, %v666_v41  ;;  %v1778_v29 = vpop.f32.mrf.mxu3 }
 0x100   : > { %v3576_v25 = vadd.f32 %v1008_v4, %v768_v24 }
 0x105   : > { %v770_v28 = vpop.f32.mrf.mxu1  ;;  %v3580_v30 = vpop.f32.mrf.mxu0 }
 0x106   : > { %v1646_v27 = vpop.f32.mrf.mxu2  ;;  %v771_v31 = vadd.f32 %v770_v28, %v669_v50  ;;  %v1780_v41 = vpop.f32.mrf.mxu3  ;;  %v3594_v50 = vld [vmem:[%s3674_s7] ss:$0 sm:$0xff] }
 0x108   : > { %v3582_v32 = vadd.f32 %v1011_v9, %v771_v31 }
 0x10d   : > { %v772_v34 = vpop.f32.mrf.mxu1  ;;  %v3584_v35 = vpop.f32.mrf.mxu0 }
 0x10e   : > { %v1649_v33 = vpop.f32.mrf.mxu2  ;;  %v773_v36 = vadd.f32 %v772_v34, %v671_v54  ;;  %v1783_v58 = vpop.f32.mrf.mxu3  ;;  %v1155_v34 = vadd.f32 %v3566_v10, %v3576_v25 }
 0x110   : > { %v3586_v38 = vadd.f32 %v1013_v15, %v773_v36 }
 0x115   : > { %v1510_v42 = vpop.f32.mrf.mxu1  ;;  %v2024_v43 = vpop.f32.mrf.mxu0 }
 0x116   : > { %v1530_v44 = vadd.f32 %v1510_v42, %v1284_v40  ;;  %v1651_v46 = vpop.f32.mrf.mxu2  ;;  %v1785_v7 = vpop.f32.mrf.mxu3 }
 0x118   : > { %v1664_v48 = vadd.f32 %v1644_v21, %v1530_v44  ;;  %v1154_v21 = vadd.f32 %v3564_v3, %v1020_v20  ;;  %v1289_v20 = vadd.f32 %v3574_v23, %v1155_v34  ;;  %v1156_v44 = vadd.f32 %v3572_v19, %v3582_v32 }
 0x11a   : > { %v1798_v49 = vadd.f32 %v1778_v29, %v1664_v48  ;;  %v1288_v14 = vadd.f32 %v3570_v17, %v1154_v21  ;;  %v1290_v47 = vadd.f32 %v3580_v30, %v1156_v44 }
 0x11c   : > { %v2044_v51 = vadd.f32 %v2024_v43, %v1798_v49 }
 0x11d   : > { %v1512_v53 = vpop.f32.mrf.mxu1  ;;  %v2026_v54 = vpop.f32.mrf.mxu0 }
 0x11e   : > { %v2056_v55 = vadd.f32 %v3594_v50, %v2044_v51  ;;  %v1531_v57 = vadd.f32 %v1512_v53, %v1285_v45  ;;  %v1654_v60 = vpop.f32.mrf.mxu2  ;;  %v1788_v61 = vpop.f32.mrf.mxu3  ;;  %v1157_v53 = vadd.f32 %v3578_v26, %v3586_v38 }
 0x120   : > { %2064 = vst [vmem:[%s3598_s14] sm:$0xff] %v2056_v55  ;;  %v1665_v52 = vadd.f32 %v1646_v27, %v1531_v57  ;;  %v1291_v55 = vadd.f32 %v3584_v35, %v1157_v53 }
 0x122   : > { %v1799_v39 = vadd.f32 %v1780_v41, %v1665_v52 }
 0x124   : > { %v2045_v63 = vadd.f32 %v2026_v54, %v1799_v39 }
 0x125   : > { %v1515_v0 = vpop.f32.mrf.mxu1  ;;  %v2029_v1 = vpop.f32.mrf.mxu0 }
 0x126   : > { %v2057_v2 = vadd.f32 %v3594_v50, %v2045_v63  ;;  %v1532_v4 = vadd.f32 %v1515_v0, %v1286_v62  ;;  %v1656_v9 = vpop.f32.mrf.mxu2  ;;  %v1790_v40 = vpop.f32.mrf.mxu3 }
 0x128   : > { %2065 = vst [vmem:[%s3598_s14 + $0x8] sm:$0xff] %v2057_v2  ;;  %v1666_v56 = vadd.f32 %v1649_v33, %v1532_v4 }
 0x12a   : > { %v1800_v8 = vadd.f32 %v1783_v58, %v1666_v56 }
 0x12c   : > { %v2046_v13 = vadd.f32 %v2029_v1, %v1800_v8 }
 0x12d   : > { %v1517_v15 = vpop.f32.mrf.mxu1  ;;  %v2031_v16 = vpop.f32.mrf.mxu0 }
 0x12e   : > { %v2058_v6 = vadd.f32 %v3594_v50, %v2046_v13  ;;  %v1533_v18 = vadd.f32 %v1517_v15, %v1287_v11  ;;  %v1659_v28 = vpop.f32.mrf.mxu2  ;;  %v1793_v51 = vpop.f32.mrf.mxu3 }
 0x130   : > { %2066 = vst [vmem:[%s3598_s14 + $0x10] sm:$0xff] %v2058_v6  ;;  %v1667_v22 = vadd.f32 %v1651_v46, %v1533_v18 }
 0x132   : > { %v1801_v24 = vadd.f32 %v1785_v7, %v1667_v22 }
 0x134   : > { %v2047_v27 = vadd.f32 %v2031_v16, %v1801_v24 }
 0x135   : > { %v1520_v31 = vpop.f32.mrf.mxu1  ;;  %v2034_v33 = vpop.f32.mrf.mxu0 }
 0x136   : > { %v2059_v12 = vadd.f32 %v3594_v50, %v2047_v27  ;;  %v1534_v29 = vadd.f32 %v1520_v31, %v1288_v14  ;;  %v1661_v43 = vpop.f32.mrf.mxu2  ;;  %v1795_v38 = vpop.f32.mrf.mxu3 }
 0x138   : > { %2067 = vst [vmem:[%s3598_s14 + $0x18] sm:$0xff] %v2059_v12  ;;  %v1668_v36 = vadd.f32 %v1654_v60, %v1534_v29 }
 0x13a   : > { %v1802_v3 = vadd.f32 %v1788_v61, %v1668_v36 }
 0x13c   : > { %v2048_v37 = vadd.f32 %v2034_v33, %v1802_v3 }
 0x13d   : > { %v1522_v41 = vpop.f32.mrf.mxu1  ;;  %v2036_v10 = vpop.f32.mrf.mxu0 }
 0x13e   : > { %v2060_v17 = vadd.f32 %v3594_v50, %v2048_v37  ;;  %v1535_v42 = vadd.f32 %v1522_v41, %v1289_v20  ;;  %v2039_v32 = vpop.f32.mrf.mxu2 }
 0x140   : > { %2068 = vst [vmem:[%s3598_s14 + $0x20] sm:$0xff] %v2060_v17  ;;  %v1669_v46 = vadd.f32 %v1656_v9, %v1535_v42 }
 0x142   : > { %v1803_v25 = vadd.f32 %v1790_v40, %v1669_v46 }
 0x144   : > { %v2049_v48 = vadd.f32 %v2036_v10, %v1803_v25 }
 0x145   : > { %v1525_v23 = vpop.f32.mrf.mxu1 }
 0x146   : > { %v2061_v49 = vadd.f32 %v3594_v50, %v2049_v48  ;;  %v1536_v45 = vadd.f32 %v1525_v23, %v1290_v47  ;;  %v2041_v35 = vpop.f32.mrf.mxu2 }
 0x148   : > { %2069 = vst [vmem:[%s3598_s14 + $0x28] sm:$0xff] %v2061_v49  ;;  %v1670_v19 = vadd.f32 %v1659_v28, %v1536_v45 }
 0x14a   : > { %v1804_v54 = vadd.f32 %v1793_v51, %v1670_v19 }
 0x14c   : > { %v2050_v57 = vadd.f32 %v2039_v32, %v1804_v54 }
 0x14d   : > { %v1527_v30 = vpop.f32.mrf.mxu1 }
 0x14e   : > { %v2062_v58 = vadd.f32 %v3594_v50, %v2050_v57  ;;  %v1537_v59 = vadd.f32 %v1527_v30, %v1291_v55 }
 0x150   : > { %2070 = vst [vmem:[%s3598_s14 + $0x30] sm:$0xff] %v2062_v58  ;;  %v1671_v26 = vadd.f32 %v1661_v43, %v1537_v59 }
 0x152   : > { %v1805_v52 = vadd.f32 %v1795_v38, %v1671_v26 }
 0x154   : > { %v2051_v60 = vadd.f32 %v2041_v35, %v1805_v52 }
 0x156   : > { %v2063_v39 = vadd.f32 %v3594_v50, %v2051_v60 }
 0x158   : > { %2071 = vst [vmem:[%s3598_s14 + $0x38] sm:$0xff] %v2063_v39 }
 0x159   : > { %3007 = shalt.err (!%p3004_p5)
}
 0x15a   : > { %s3060_s26 = smov 128   ;;  %s3061_s14 = smov 8  }
 0x15b   : > { %2922 = dma.vmem_to_hbm [thread:$0]  (%p3147_p4), %s2088_s24, 1024, %s2090_s16, %s2073_s30, %s3060_s26, %s3060_s26, %s3061_s14  }
 0x15c PF: > { %p2928_p6 = scmp.ge.s32.totalorder %s3058_s10, 2  ;;  %s2104_s19 = sand.u32 1, %s3038_s27  }
 0x15d   : > { %s2105_s20 = scalar_lea.sflag [#allocation3], %s2104_s19 }
 0x15e   : > { %p2925_p7 = pnand %p2928_p6, %p3154_p8 }
 0x160   : > { %p2926_p9 = pneg %p2925_p7 }
 0x162   : > { %3033 = dma.done.wait (%p2926_p9), %s2105_s20, 1024  }
 0x163   : > { %3035 = vsyncadd (%p2926_p9), %s2105_s20, 4294966272  ;;  %s21_s10 = sadd.s32 1, %s3058_s10   ;;  %s3686_s15 = sld [smem:[#allocation5_spill]] }
 0x164   : > { %p18_p10 = scmp.ge.s32.totalorder %s21_s10, 4   ;;  %s3687_s27 = smov %s3042_s28 }
 0x165   : > { %s3688_s28 = smov %s3046_s29  ;;  %s3689_s29 = smov %s3160_s18 }
 0x166   : > { %s3690_s30 = smov %s3054_s9  ;;  %20 = sbr.rel (!%p18_p10) target bundleno = 7 (0x7), region = 110 }
 0x169   : > { %s3691_s9 = smov %s3686_s15 }
 0x16b   :  { %2111 = vsyncpa [#allocation3], 1 }
 0x16c   :  { %2113 = vsyncpa [#allocation3 + $0x1], 1 }

</bundles_post_ra>
